<compile_context>
chip_gen: v5e
topology: v5e:2x2
jax: 0.10.0
libtpu: 0.0.40
codegen_flags: <defaults>
</compile_context>

<pallas_src>
import jax
import jax.numpy as jnp
from jax import lax
from jax.experimental import pallas as pl
from jax.experimental.pallas import tpu as pltpu

# ---------------- small synthetic config (stands in for ViT-H-14 text tower) --
VOCAB  = 100   # real: 49408
T      = 8     # real: max_length = 77 (pad key axis to 128 at real scale)
D      = 32    # real: width = 1024
H      = 4     # real: heads = 16
HD     = D // H
FF     = 4 * D
LAYERS = 2     # real: 24
B      = 2
BT     = B * T

NUM_BT_TILES = 2               # leading 'parallel' grid axis (v7x: 2 TensorCores)
assert B % NUM_BT_TILES == 0
B_TILE  = B // NUM_BT_TILES
BT_TILE = B_TILE * T

EPS = 1e-5
NEG = -1e9                     # finite additive causal-mask value
WDTYPE = jnp.bfloat16          # weight storage / MXU input dtype (f32 accum)
# TODO(synk): at real scale on v5e/v6e the frozen weights should be int8
# (per-channel scales) — kernel structure is unchanged; kept bf16 here.


def _layernorm(x, g, b):
    mu = jnp.mean(x, axis=-1, keepdims=True)
    var = jnp.mean(jnp.square(x - mu), axis=-1, keepdims=True)
    return (x - mu) * lax.rsqrt(var + EPS) * g + b


# ----------------------------- fused Pallas kernel -----------------------------
def clip_text_tower_kernel(
    x_ref, mask_ref,
    ln1g_ref, ln1b_ref, wqkv_ref, bqkv_ref, wo_ref, bo_ref,
    ln2g_ref, ln2b_ref, w1_ref, b1_ref, w2_ref, b2_ref,
    lnfg_ref, lnfb_ref,
    out_ref,
):
    """Grid = (batch_tile['parallel'], layer['arbitrary']).  The (BT_TILE, D)
    activation stays resident in the output VMEM block across layer steps."""
    l = pl.program_id(1)

    @pl.when(l == 0)
    def _():
        out_ref[...] = x_ref[...]

    x = out_ref[...]                                   # (BT_TILE, D) f32, VMEM-resident

    # ---- x = x + MHA(ln_1(x), causal additive mask) ----
    xn = _layernorm(x, ln1g_ref[...], ln1b_ref[...])
    qkv = (jnp.dot(xn.astype(WDTYPE), wqkv_ref[...],
                   preferred_element_type=jnp.float32)
           + bqkv_ref[...]).astype(WDTYPE)             # (BT_TILE, 3D) bf16, cast once
    # 1/sqrt(HD) is already folded into the Q columns of W_qkv at init time.
    q = qkv[:, 0 * D:1 * D].reshape(B_TILE, T, D)
    k = qkv[:, 1 * D:2 * D].reshape(B_TILE, T, D)
    v = qkv[:, 2 * D:3 * D].reshape(B_TILE, T, D)

    mask = mask_ref[...]                               # (T, T) additive, finite

    # Per-head attention, fused with the output projection: each head's context
    # multiplies a sublane row-slice of W_out and accumulates in f32 registers
    # (no (B,T,D) scratch, no masked column stores, no f32 store/reload).
    acc = None
    for h in range(H):                                 # static unroll
        sl = slice(h * HD, (h + 1) * HD)
        qh, kh, vh = q[:, :, sl], k[:, :, sl], v[:, :, sl]       # bf16 (B_TILE,T,HD)
        s = jnp.einsum("bqd,bkd->bqk", qh, kh,
                       preferred_element_type=jnp.float32)       # (B_TILE,T,T) f32
        s = s + mask[None, :, :]
        s = s - jnp.max(s, axis=-1, keepdims=True)
        p = jnp.exp(s)
        p = p * pl.reciprocal(jnp.sum(p, axis=-1, keepdims=True), approx=True)
        oh = jnp.einsum("bqk,bkd->bqd", p.astype(WDTYPE), vh,
                        preferred_element_type=jnp.float32)      # (B_TILE,T,HD)
        proj = jnp.dot(oh.reshape(BT_TILE, HD).astype(WDTYPE),
                       wo_ref[sl, :],                            # sublane slice of W_out
                       preferred_element_type=jnp.float32)       # (BT_TILE, D)
        acc = proj if acc is None else acc + proj
    x = x + acc + bo_ref[...]

    # ---- x = x + MLP(ln_2(x)) ----
    xn2 = _layernorm(x, ln2g_ref[...], ln2b_ref[...])
    h1 = jnp.dot(xn2.astype(WDTYPE), w1_ref[...],
                 preferred_element_type=jnp.float32) + b1_ref[...]
    # TODO(synk): open_clip uses exact erf-GELU; tanh approximation used here.
    h1 = jax.nn.gelu(h1, approximate=True)
    h2 = jnp.dot(h1.astype(WDTYPE), w2_ref[...],
                 preferred_element_type=jnp.float32) + b2_ref[...]
    x = x + h2

    out_ref[...] = x

    @pl.when(l == pl.num_programs(1) - 1)              # fold ln_final into last step
    def _():
        out_ref[...] = _layernorm(x, lnfg_ref[...], lnfb_ref[...])


# ----------------------------- wrappers ---------------------------------------
def _stacked(d0, d1):
    # one layer's full weight block; leading layer axis squeezed out
    return pl.BlockSpec((None, d0, d1), lambda bt, l: (l, 0, 0))


def _const(d0, d1):
    # constant block index across the whole grid -> fetched once / resident
    return pl.BlockSpec((d0, d1), lambda bt, l: (0, 0))


def encode_with_transformer(x_btd, params, layer="last"):
    n_blocks = LAYERS - (0 if layer == "last" else 1)
    x2d = x_btd.reshape(BT, D).astype(jnp.float32)

    layer_w_keys = ["ln1_g", "ln1_b", "w_qkv", "b_qkv", "w_out", "b_out",
                    "ln2_g", "ln2_b", "w_fc", "b_fc", "w_proj", "b_proj"]
    weight_keys = layer_w_keys + ["lnf_g", "lnf_b"]

    flops = n_blocks * (2 * BT * D * 3 * D + 2 * BT * D * D
                        + 4 * BT * D * FF + 4 * B * H * T * T * HD)
    transcendentals = n_blocks * (B * H * T * T + BT * FF)
    bytes_accessed = (2 * x2d.size * 4 + params["attn_mask"].size * 4
                      + sum(int(params[k].size * params[k].dtype.itemsize)
                            for k in weight_keys))

    # VMEM budget: double-buffered per-layer weight set + activation + headroom,
    # capped below v7x's 64 MiB physical VMEM.
    per_layer_bytes = sum(int((params[k].size // LAYERS) * params[k].dtype.itemsize)
                          for k in layer_w_keys)
    vmem_limit = int(min(56 << 20,
                         max(32 << 20, 2 * per_layer_bytes + 8 * BT * D * 4 + (2 << 20))))

    out = pl.pallas_call(
        clip_text_tower_kernel,
        out_shape=jax.ShapeDtypeStruct((BT, D), jnp.float32),
        grid=(NUM_BT_TILES, n_blocks),
        in_specs=[
            pl.BlockSpec((BT_TILE, D), lambda bt, l: (bt, 0)),   # x (per batch tile)
            _const(T, T),                             # additive causal mask
            _stacked(1, D), _stacked(1, D),           # ln1 gamma, beta
            _stacked(D, 3 * D), _stacked(1, 3 * D),   # W_qkv (scale-folded), b_qkv
            _stacked(D, D), _stacked(1, D),           # W_out, b_out
            _stacked(1, D), _stacked(1, D),           # ln2 gamma, beta
            _stacked(D, FF), _stacked(1, FF),         # W_fc, b_fc
            _stacked(FF, D), _stacked(1, D),          # W_proj, b_proj
            _const(1, D), _const(1, D),               # ln_final gamma, beta
        ],
        out_specs=pl.BlockSpec((BT_TILE, D), lambda bt, l: (bt, 0)),  # resident over l
        input_output_aliases={0: 0},                  # x buffer reused for output
        compiler_params=pltpu.CompilerParams(
            dimension_semantics=("parallel", "arbitrary"),  # batch-tile || , layer seq
            vmem_limit_bytes=vmem_limit,
        ),
        cost_estimate=pl.CostEstimate(flops=flops,
                                      transcendentals=transcendentals,
                                      bytes_accessed=bytes_accessed),
    )(x2d, params["attn_mask"],
      params["ln1_g"], params["ln1_b"], params["w_qkv"], params["b_qkv"],
      params["w_out"], params["b_out"], params["ln2_g"], params["ln2_b"],
      params["w_fc"], params["b_fc"], params["w_proj"], params["b_proj"],
      params["lnf_g"], params["lnf_b"])
    return out.reshape(B, T, D)


def frozen_openclip_embedder(tokens, params, layer="last"):
    """encode_with_transformer(tokens); layer='last' runs all blocks + ln_final."""
    # TODO(synk): open_clip.tokenize (string -> token ids) has no kernel
    # equivalent; integer token ids are taken as input directly.  The embedding
    # gather stays in XLA glue.
    x = jnp.take(params["tok_emb"], tokens, axis=0) + params["pos_emb"][None]
    return encode_with_transformer(x, params, layer=layer)


def init_params(key):
    ks = jax.random.split(key, 6)

    def nrm(k, shape, scale):
        return jax.random.normal(k, shape, jnp.float32) * scale

    causal = jnp.triu(jnp.ones((T, T), jnp.bool_), k=1)
    scale = HD ** -0.5
    # Fold the 1/sqrt(HD) attention scale into the Q projection (frozen weights).
    w_qkv = nrm(ks[2], (LAYERS, D, 3 * D), 0.02)
    w_qkv = w_qkv.at[:, :, :D].multiply(scale)
    b_qkv = jnp.zeros((LAYERS, 1, 3 * D), jnp.float32)
    b_qkv = b_qkv.at[:, :, :D].multiply(scale)

    return {
        "tok_emb": nrm(ks[0], (VOCAB, D), 0.02),
        "pos_emb": nrm(ks[1], (T, D), 0.01),
        "lnf_g": jnp.ones((1, D), jnp.float32),
        "lnf_b": jnp.zeros((1, D), jnp.float32),
        "ln1_g": jnp.ones((LAYERS, 1, D), jnp.float32),
        "ln1_b": jnp.zeros((LAYERS, 1, D), jnp.float32),
        "ln2_g": jnp.ones((LAYERS, 1, D), jnp.float32),
        "ln2_b": jnp.zeros((LAYERS, 1, D), jnp.float32),
        "w_qkv": w_qkv.astype(WDTYPE),
        "b_qkv": b_qkv,
        "w_out": nrm(ks[3], (LAYERS, D, D), 0.02).astype(WDTYPE),
        "b_out": jnp.zeros((LAYERS, 1, D), jnp.float32),
        "w_fc": nrm(ks[4], (LAYERS, D, FF), 0.02).astype(WDTYPE),
        "b_fc": jnp.zeros((LAYERS, 1, FF), jnp.float32),
        "w_proj": nrm(ks[5], (LAYERS, FF, D), 0.02).astype(WDTYPE),
        "b_proj": jnp.zeros((LAYERS, 1, D), jnp.float32),
        "attn_mask": jnp.where(causal, NEG, 0.0).astype(jnp.float32),
    }


# ----------------------------- pure-JAX reference ------------------------------
def _reference(tokens, params):
    x = jnp.take(params["tok_emb"], tokens, axis=0) + params["pos_emb"][None]  # (B,T,D)
    mask = params["attn_mask"]

    def mm(a, w):  # same numerics as the kernel: bf16 MXU inputs, f32 accumulation
        return jnp.dot(a.astype(WDTYPE), w, preferred_element_type=jnp.float32)

    for l in range(LAYERS):
        xn = _layernorm(x, params["ln1_g"][l], params["ln1_b"][l])
        qkv = (mm(xn.reshape(BT, D), params["w_qkv"][l])
               + params["b_qkv"][l]).astype(WDTYPE)
        q, k, v = jnp.split(qkv, 3, axis=-1)
        q = q.reshape(B, T, H, HD).transpose(0, 2, 1, 3)   # scale already in W_qkv
        k = k.reshape(B, T, H, HD).transpose(0, 2, 1, 3)
        v = v.reshape(B, T, H, HD).transpose(0, 2, 1, 3)
        s = jnp.einsum("bhqd,bhkd->bhqk", q, k,
                       preferred_element_type=jnp.float32) + mask
        p = jax.nn.softmax(s, axis=-1)
        a = jnp.einsum("bhqk,bhkd->bhqd", p.astype(WDTYPE), v,
                       preferred_element_type=jnp.float32)
        a = a.transpose(0, 2, 1, 3).reshape(BT, D)
        x = x + (mm(a, params["w_out"][l]) + params["b_out"][l]).reshape(B, T, D)
        xn2 = _layernorm(x, params["ln2_g"][l], params["ln2_b"][l])
        h1 = jax.nn.gelu(mm(xn2.reshape(BT, D), params["w_fc"][l]) + params["b_fc"][l],
                         approximate=True)
        h2 = mm(h1, params["w_proj"][l]) + params["b_proj"][l]
        x = x + h2.reshape(B, T, D)
    return _layernorm(x, params["lnf_g"], params["lnf_b"])


if __name__ == "__main__":
    key = jax.random.PRNGKey(0)
    k_tok, k_param = jax.random.split(key)
    tokens = jax.random.randint(k_tok, (B, T), 0, VOCAB, dtype=jnp.int32)
    params = init_params(k_param)

    fwd = jax.jit(frozen_openclip_embedder)
    z = jax.block_until_ready(fwd(tokens, params))

    z_ref = _reference(tokens, params)
    assert z.shape == (B, T, D), z.shape
    max_err = float(jnp.max(jnp.abs(z - z_ref)))
    assert jnp.allclose(z, z_ref, rtol=1e-2, atol=1e-2), max_err

    print("KERNEL_OK")
</pallas_src>

<mosaic_0001>
module attributes {stable_mosaic.version = 11 : i64} {
  func.func @clip_text_tower_kernel(%arg0: i32, %arg1: i32, %arg2: memref<8x32xf32, #tpu.memory_space<vmem>>, %arg3: memref<8x8xf32, #tpu.memory_space<vmem>>, %arg4: memref<1x1x32xf32, #tpu.memory_space<vmem>>, %arg5: memref<1x1x32xf32, #tpu.memory_space<vmem>>, %arg6: memref<1x32x96xbf16, #tpu.memory_space<vmem>>, %arg7: memref<1x1x96xf32, #tpu.memory_space<vmem>>, %arg8: memref<1x32x32xbf16, #tpu.memory_space<vmem>>, %arg9: memref<1x1x32xf32, #tpu.memory_space<vmem>>, %arg10: memref<1x1x32xf32, #tpu.memory_space<vmem>>, %arg11: memref<1x1x32xf32, #tpu.memory_space<vmem>>, %arg12: memref<1x32x128xbf16, #tpu.memory_space<vmem>>, %arg13: memref<1x1x128xf32, #tpu.memory_space<vmem>>, %arg14: memref<1x128x32xbf16, #tpu.memory_space<vmem>>, %arg15: memref<1x1x32xf32, #tpu.memory_space<vmem>>, %arg16: memref<1x32xf32, #tpu.memory_space<vmem>>, %arg17: memref<1x32xf32, #tpu.memory_space<vmem>>, %arg18: memref<8x32xf32, #tpu.memory_space<vmem>>) attributes {dimension_semantics = [#tpu.dimension_semantics<parallel>, #tpu.dimension_semantics<arbitrary>], iteration_bounds = array<i64: 2, 2>, scalar_prefetch = 0 : i64, scratch_operands = 0 : i64, tpu.core_type = #tpu.core_type<tc>, window_params = [{transform_indices = @transform_0, window_bounds = array<i64: 8, 32>}, {pipeline_mode = #tpu.pipeline_mode<synchronous>, transform_indices = @transform_1, window_bounds = array<i64: 8, 8>}, {transform_indices = @transform_2, window_bounds = array<i64: 1, 1, 32>}, {transform_indices = @transform_3, window_bounds = array<i64: 1, 1, 32>}, {transform_indices = @transform_4, window_bounds = array<i64: 1, 32, 96>}, {transform_indices = @transform_5, window_bounds = array<i64: 1, 1, 96>}, {transform_indices = @transform_6, window_bounds = array<i64: 1, 32, 32>}, {transform_indices = @transform_7, window_bounds = array<i64: 1, 1, 32>}, {transform_indices = @transform_8, window_bounds = array<i64: 1, 1, 32>}, {transform_indices = @transform_9, window_bounds = array<i64: 1, 1, 32>}, {transform_indices = @transform_10, window_bounds = array<i64: 1, 32, 128>}, {transform_indices = @transform_11, window_bounds = array<i64: 1, 1, 128>}, {transform_indices = @transform_12, window_bounds = array<i64: 1, 128, 32>}, {transform_indices = @transform_13, window_bounds = array<i64: 1, 1, 32>}, {pipeline_mode = #tpu.pipeline_mode<synchronous>, transform_indices = @transform_14, window_bounds = array<i64: 1, 32>}, {pipeline_mode = #tpu.pipeline_mode<synchronous>, transform_indices = @transform_15, window_bounds = array<i64: 1, 32>}, {transform_indices = @transform_16, window_bounds = array<i64: 8, 32>}]} {
    %c0_i32 = arith.constant 0 : i32
    %0 = arith.cmpi eq, %arg1, %c0_i32 : i32
    %1 = arith.extui %0 : i1 to i32
    %c0_i32_0 = arith.constant 0 : i32
    %2 = arith.cmpi ne, %1, %c0_i32_0 : i32
    scf.if %2 {
      %c0_85 = arith.constant 0 : index
      %c0_86 = arith.constant 0 : index
      %206 = vector.load %arg2[%c0_85, %c0_86] : memref<8x32xf32, #tpu.memory_space<vmem>>, vector<8x32xf32>
      %c0_87 = arith.constant 0 : index
      %c0_88 = arith.constant 0 : index
      %207 = vector.load %arg18[%c0_87, %c0_88] : memref<8x32xf32, #tpu.memory_space<vmem>>, vector<8x32xf32>
      tpu.vector_store %arg18[%c0_87, %c0_88], %206 {strides = array<i32>} : memref<8x32xf32, #tpu.memory_space<vmem>>, vector<8x32xf32>,
    } else {
    }
    %c0 = arith.constant 0 : index
    %c0_1 = arith.constant 0 : index
    %3 = vector.load %arg18[%c0, %c0_1] : memref<8x32xf32, #tpu.memory_space<vmem>>, vector<8x32xf32>
    %c0_2 = arith.constant 0 : index
    %c0_3 = arith.constant 0 : index
    %c0_4 = arith.constant 0 : index
    %4 = vector.load %arg4[%c0_2, %c0_3, %c0_4] : memref<1x1x32xf32, #tpu.memory_space<vmem>>, vector<1x1x32xf32>
    %5 = vector.shape_cast %4 : vector<1x1x32xf32> to vector<1x32xf32>
    %c0_5 = arith.constant 0 : index
    %c0_6 = arith.constant 0 : index
    %c0_7 = arith.constant 0 : index
    %6 = vector.load %arg5[%c0_5, %c0_6, %c0_7] : memref<1x1x32xf32, #tpu.memory_space<vmem>>, vector<1x1x32xf32>
    %7 = vector.shape_cast %6 : vector<1x1x32xf32> to vector<1x32xf32>
    %cst = arith.constant dense<0.000000e+00> : vector<8xf32>
    %8 = vector.multi_reduction <add>, %3, %cst [1] : vector<8x32xf32> to vector<8xf32>
    %9 = vector.shape_cast %8 : vector<8xf32> to vector<8x1xf32>
    %cst_8 = arith.constant 3.200000e+01 : f32
    %10 = vector.broadcast %cst_8 : f32 to vector<8x1xf32>
    %11 = arith.divf %9, %10 : vector<8x1xf32>
    %12 = vector.broadcast %11 : vector<8x1xf32> to vector<8x32xf32>
    %13 = arith.subf %3, %12 : vector<8x32xf32>
    %14 = arith.mulf %13, %13 : vector<8x32xf32>
    %cst_9 = arith.constant dense<0.000000e+00> : vector<8xf32>
    %15 = vector.multi_reduction <add>, %14, %cst_9 [1] : vector<8x32xf32> to vector<8xf32>
    %16 = vector.shape_cast %15 : vector<8xf32> to vector<8x1xf32>
    %cst_10 = arith.constant 3.200000e+01 : f32
    %17 = vector.broadcast %cst_10 : f32 to vector<8x1xf32>
    %18 = arith.divf %16, %17 : vector<8x1xf32>
    %19 = vector.broadcast %11 : vector<8x1xf32> to vector<8x32xf32>
    %20 = arith.subf %3, %19 : vector<8x32xf32>
    %cst_11 = arith.constant 9.99999974E-6 : f32
    %21 = vector.broadcast %cst_11 : f32 to vector<8x1xf32>
    %22 = arith.addf %18, %21 : vector<8x1xf32>
    %23 = math.rsqrt %22 : vector<8x1xf32>
    %24 = vector.broadcast %23 : vector<8x1xf32> to vector<8x32xf32>
    %25 = arith.mulf %20, %24 : vector<8x32xf32>
    %26 = vector.broadcast %5 : vector<1x32xf32> to vector<8x32xf32>
    %27 = arith.mulf %25, %26 : vector<8x32xf32>
    %28 = vector.broadcast %7 : vector<1x32xf32> to vector<8x32xf32>
    %29 = arith.addf %27, %28 : vector<8x32xf32>
    %30 = arith.truncf %29 : vector<8x32xf32> to vector<8x32xbf16>
    %c0_12 = arith.constant 0 : index
    %c0_13 = arith.constant 0 : index
    %c0_14 = arith.constant 0 : index
    %31 = vector.load %arg6[%c0_12, %c0_13, %c0_14] : memref<1x32x96xbf16, #tpu.memory_space<vmem>>, vector<1x32x96xbf16>
    %32 = vector.shape_cast %31 : vector<1x32x96xbf16> to vector<32x96xbf16>
    %cst_15 = arith.constant dense<0.000000e+00> : vector<8x96xf32>
    %33 = tpu.matmul %30, %32, %cst_15 {dimension_numbers = #tpu.dot_dimension_numbers<[1], [0], [0], [1], [0, 0, 1, 1], [], []>} : vector<8x32xbf16>, vector<32x96xbf16>, vector<8x96xf32> -> vector<8x96xf32>
    %c0_16 = arith.constant 0 : index
    %c0_17 = arith.constant 0 : index
    %c0_18 = arith.constant 0 : index
    %34 = vector.load %arg7[%c0_16, %c0_17, %c0_18] : memref<1x1x96xf32, #tpu.memory_space<vmem>>, vector<1x1x96xf32>
    %35 = vector.shape_cast %34 : vector<1x1x96xf32> to vector<1x96xf32>
    %36 = vector.broadcast %35 : vector<1x96xf32> to vector<8x96xf32>
    %37 = arith.addf %33, %36 : vector<8x96xf32>
    %38 = arith.truncf %37 : vector<8x96xf32> to vector<8x96xbf16>
    %39 = vector.extract_strided_slice %38 {offsets = [0, 0], sizes = [8, 32], strides = [1, 1]} : vector<8x96xbf16> to vector<8x32xbf16>
    %40 = vector.shape_cast %39 : vector<8x32xbf16> to vector<1x8x32xbf16>
    %41 = vector.extract_strided_slice %38 {offsets = [0, 32], sizes = [8, 32], strides = [1, 1]} : vector<8x96xbf16> to vector<8x32xbf16>
    %42 = vector.shape_cast %41 : vector<8x32xbf16> to vector<1x8x32xbf16>
    %43 = vector.extract_strided_slice %38 {offsets = [0, 64], sizes = [8, 32], strides = [1, 1]} : vector<8x96xbf16> to vector<8x32xbf16>
    %44 = vector.shape_cast %43 : vector<8x32xbf16> to vector<1x8x32xbf16>
    %c0_19 = arith.constant 0 : index
    %c0_20 = arith.constant 0 : index
    %45 = vector.load %arg3[%c0_19, %c0_20] : memref<8x8xf32, #tpu.memory_space<vmem>>, vector<8x8xf32>
    %46 = vector.extract_strided_slice %40 {offsets = [0, 0, 0], sizes = [1, 8, 8], strides = [1, 1, 1]} : vector<1x8x32xbf16> to vector<1x8x8xbf16>
    %47 = vector.extract_strided_slice %42 {offsets = [0, 0, 0], sizes = [1, 8, 8], strides = [1, 1, 1]} : vector<1x8x32xbf16> to vector<1x8x8xbf16>
    %48 = vector.extract_strided_slice %44 {offsets = [0, 0, 0], sizes = [1, 8, 8], strides = [1, 1, 1]} : vector<1x8x32xbf16> to vector<1x8x8xbf16>
    "tpu.trace_start"() <{level = 10 : i32, message = "bqd,bkd->bqk"}> : () -> ()
    %cst_21 = arith.constant dense<0.000000e+00> : vector<1x8x8xf32>
    %49 = tpu.matmul %46, %47, %cst_21 {dimension_numbers = #tpu.dot_dimension_numbers<[2], [2], [1], [1], [0, 0, 0, 1, 1, 1], [0], [0]>} : vector<1x8x8xbf16>, vector<1x8x8xbf16>, vector<1x8x8xf32> -> vector<1x8x8xf32>
    "tpu.trace_stop"() : () -> ()
    %50 = vector.shape_cast %45 : vector<8x8xf32> to vector<1x8x8xf32>
    %51 = arith.addf %49, %50 : vector<1x8x8xf32>
    %cst_22 = arith.constant dense<0xFF800000> : vector<1x8xf32>
    %52 = vector.multi_reduction <maximumf>, %51, %cst_22 [2] : vector<1x8x8xf32> to vector<1x8xf32>
    %53 = vector.shape_cast %52 : vector<1x8xf32> to vector<1x8x1xf32>
    %54 = vector.broadcast %53 : vector<1x8x1xf32> to vector<1x8x8xf32>
    %55 = arith.subf %51, %54 : vector<1x8x8xf32>
    %56 = math.exp %55 : vector<1x8x8xf32>
    %cst_23 = arith.constant dense<0.000000e+00> : vector<1x8xf32>
    %57 = vector.multi_reduction <add>, %56, %cst_23 [2] : vector<1x8x8xf32> to vector<1x8xf32>
    %58 = vector.shape_cast %57 : vector<1x8xf32> to vector<1x8x1xf32>
    %59 = tpu.reciprocal %58 {approx = true} : vector<1x8x1xf32> -> vector<1x8x1xf32>
    %60 = vector.broadcast %59 : vector<1x8x1xf32> to vector<1x8x8xf32>
    %61 = arith.mulf %56, %60 : vector<1x8x8xf32>
    %62 = arith.truncf %61 : vector<1x8x8xf32> to vector<1x8x8xbf16>
    "tpu.trace_start"() <{level = 10 : i32, message = "bqk,bkd->bqd"}> : () -> ()
    %cst_24 = arith.constant dense<0.000000e+00> : vector<1x8x8xf32>
    %63 = tpu.matmul %62, %48, %cst_24 {dimension_numbers = #tpu.dot_dimension_numbers<[2], [1], [1], [2], [0, 0, 0, 1, 1, 2], [0], [0]>} : vector<1x8x8xbf16>, vector<1x8x8xbf16>, vector<1x8x8xf32> -> vector<1x8x8xf32>
    "tpu.trace_stop"() : () -> ()
    %64 = vector.shape_cast %63 : vector<1x8x8xf32> to vector<8x8xf32>
    %65 = arith.truncf %64 : vector<8x8xf32> to vector<8x8xbf16>
    %c0_25 = arith.constant 0 : index
    %c0_26 = arith.constant 0 : index
    %c0_27 = arith.constant 0 : index
    %66 = vector.load %arg8[%c0_25, %c0_26, %c0_27] : memref<1x32x32xbf16, #tpu.memory_space<vmem>>, vector<1x8x32xbf16>
    %67 = vector.shape_cast %66 : vector<1x8x32xbf16> to vector<8x32xbf16>
    %cst_28 = arith.constant dense<0.000000e+00> : vector<8x32xf32>
    %68 = tpu.matmul %65, %67, %cst_28 {dimension_numbers = #tpu.dot_dimension_numbers<[1], [0], [0], [1], [0, 0, 1, 1], [], []>} : vector<8x8xbf16>, vector<8x32xbf16>, vector<8x32xf32> -> vector<8x32xf32>
    %69 = vector.extract_strided_slice %40 {offsets = [0, 0, 8], sizes = [1, 8, 8], strides = [1, 1, 1]} : vector<1x8x32xbf16> to vector<1x8x8xbf16>
    %70 = vector.extract_strided_slice %42 {offsets = [0, 0, 8], sizes = [1, 8, 8], strides = [1, 1, 1]} : vector<1x8x32xbf16> to vector<1x8x8xbf16>
    %71 = vector.extract_strided_slice %44 {offsets = [0, 0, 8], sizes = [1, 8, 8], strides = [1, 1, 1]} : vector<1x8x32xbf16> to vector<1x8x8xbf16>
    "tpu.trace_start"() <{level = 10 : i32, message = "bqd,bkd->bqk"}> : () -> ()
    %cst_29 = arith.constant dense<0.000000e+00> : vector<1x8x8xf32>
    %72 = tpu.matmul %69, %70, %cst_29 {dimension_numbers = #tpu.dot_dimension_numbers<[2], [2], [1], [1], [0, 0, 0, 1, 1, 1], [0], [0]>} : vector<1x8x8xbf16>, vector<1x8x8xbf16>, vector<1x8x8xf32> -> vector<1x8x8xf32>
    "tpu.trace_stop"() : () -> ()
    %73 = vector.shape_cast %45 : vector<8x8xf32> to vector<1x8x8xf32>
    %74 = arith.addf %72, %73 : vector<1x8x8xf32>
    %cst_30 = arith.constant dense<0xFF800000> : vector<1x8xf32>
    %75 = vector.multi_reduction <maximumf>, %74, %cst_30 [2] : vector<1x8x8xf32> to vector<1x8xf32>
    %76 = vector.shape_cast %75 : vector<1x8xf32> to vector<1x8x1xf32>
    %77 = vector.broadcast %76 : vector<1x8x1xf32> to vector<1x8x8xf32>
    %78 = arith.subf %74, %77 : vector<1x8x8xf32>
    %79 = math.exp %78 : vector<1x8x8xf32>
    %cst_31 = arith.constant dense<0.000000e+00> : vector<1x8xf32>
    %80 = vector.multi_reduction <add>, %79, %cst_31 [2] : vector<1x8x8xf32> to vector<1x8xf32>
    %81 = vector.shape_cast %80 : vector<1x8xf32> to vector<1x8x1xf32>
    %82 = tpu.reciprocal %81 {approx = true} : vector<1x8x1xf32> -> vector<1x8x1xf32>
    %83 = vector.broadcast %82 : vector<1x8x1xf32> to vector<1x8x8xf32>
    %84 = arith.mulf %79, %83 : vector<1x8x8xf32>
    %85 = arith.truncf %84 : vector<1x8x8xf32> to vector<1x8x8xbf16>
    "tpu.trace_start"() <{level = 10 : i32, message = "bqk,bkd->bqd"}> : () -> ()
    %cst_32 = arith.constant dense<0.000000e+00> : vector<1x8x8xf32>
    %86 = tpu.matmul %85, %71, %cst_32 {dimension_numbers = #tpu.dot_dimension_numbers<[2], [1], [1], [2], [0, 0, 0, 1, 1, 2], [0], [0]>} : vector<1x8x8xbf16>, vector<1x8x8xbf16>, vector<1x8x8xf32> -> vector<1x8x8xf32>
    "tpu.trace_stop"() : () -> ()
    %87 = vector.shape_cast %86 : vector<1x8x8xf32> to vector<8x8xf32>
    %88 = arith.truncf %87 : vector<8x8xf32> to vector<8x8xbf16>
    %c0_33 = arith.constant 0 : index
    %c8 = arith.constant 8 : index
    %c0_34 = arith.constant 0 : index
    %89 = vector.load %arg8[%c0_33, %c8, %c0_34] : memref<1x32x32xbf16, #tpu.memory_space<vmem>>, vector<1x8x32xbf16>
    %90 = vector.shape_cast %89 : vector<1x8x32xbf16> to vector<8x32xbf16>
    %cst_35 = arith.constant dense<0.000000e+00> : vector<8x32xf32>
    %91 = tpu.matmul %88, %90, %cst_35 {dimension_numbers = #tpu.dot_dimension_numbers<[1], [0], [0], [1], [0, 0, 1, 1], [], []>} : vector<8x8xbf16>, vector<8x32xbf16>, vector<8x32xf32> -> vector<8x32xf32>
    %92 = arith.addf %68, %91 : vector<8x32xf32>
    %93 = vector.extract_strided_slice %40 {offsets = [0, 0, 16], sizes = [1, 8, 8], strides = [1, 1, 1]} : vector<1x8x32xbf16> to vector<1x8x8xbf16>
    %94 = vector.extract_strided_slice %42 {offsets = [0, 0, 16], sizes = [1, 8, 8], strides = [1, 1, 1]} : vector<1x8x32xbf16> to vector<1x8x8xbf16>
    %95 = vector.extract_strided_slice %44 {offsets = [0, 0, 16], sizes = [1, 8, 8], strides = [1, 1, 1]} : vector<1x8x32xbf16> to vector<1x8x8xbf16>
    "tpu.trace_start"() <{level = 10 : i32, message = "bqd,bkd->bqk"}> : () -> ()
    %cst_36 = arith.constant dense<0.000000e+00> : vector<1x8x8xf32>
    %96 = tpu.matmul %93, %94, %cst_36 {dimension_numbers = #tpu.dot_dimension_numbers<[2], [2], [1], [1], [0, 0, 0, 1, 1, 1], [0], [0]>} : vector<1x8x8xbf16>, vector<1x8x8xbf16>, vector<1x8x8xf32> -> vector<1x8x8xf32>
    "tpu.trace_stop"() : () -> ()
    %97 = vector.shape_cast %45 : vector<8x8xf32> to vector<1x8x8xf32>
    %98 = arith.addf %96, %97 : vector<1x8x8xf32>
    %cst_37 = arith.constant dense<0xFF800000> : vector<1x8xf32>
    %99 = vector.multi_reduction <maximumf>, %98, %cst_37 [2] : vector<1x8x8xf32> to vector<1x8xf32>
    %100 = vector.shape_cast %99 : vector<1x8xf32> to vector<1x8x1xf32>
    %101 = vector.broadcast %100 : vector<1x8x1xf32> to vector<1x8x8xf32>
    %102 = arith.subf %98, %101 : vector<1x8x8xf32>
    %103 = math.exp %102 : vector<1x8x8xf32>
    %cst_38 = arith.constant dense<0.000000e+00> : vector<1x8xf32>
    %104 = vector.multi_reduction <add>, %103, %cst_38 [2] : vector<1x8x8xf32> to vector<1x8xf32>
    %105 = vector.shape_cast %104 : vector<1x8xf32> to vector<1x8x1xf32>
    %106 = tpu.reciprocal %105 {approx = true} : vector<1x8x1xf32> -> vector<1x8x1xf32>
    %107 = vector.broadcast %106 : vector<1x8x1xf32> to vector<1x8x8xf32>
    %108 = arith.mulf %103, %107 : vector<1x8x8xf32>
    %109 = arith.truncf %108 : vector<1x8x8xf32> to vector<1x8x8xbf16>
    "tpu.trace_start"() <{level = 10 : i32, message = "bqk,bkd->bqd"}> : () -> ()
    %cst_39 = arith.constant dense<0.000000e+00> : vector<1x8x8xf32>
    %110 = tpu.matmul %109, %95, %cst_39 {dimension_numbers = #tpu.dot_dimension_numbers<[2], [1], [1], [2], [0, 0, 0, 1, 1, 2], [0], [0]>} : vector<1x8x8xbf16>, vector<1x8x8xbf16>, vector<1x8x8xf32> -> vector<1x8x8xf32>
    "tpu.trace_stop"() : () -> ()
    %111 = vector.shape_cast %110 : vector<1x8x8xf32> to vector<8x8xf32>
    %112 = arith.truncf %111 : vector<8x8xf32> to vector<8x8xbf16>
    %c0_40 = arith.constant 0 : index
    %c16 = arith.constant 16 : index
    %c0_41 = arith.constant 0 : index
    %113 = vector.load %arg8[%c0_40, %c16, %c0_41] : memref<1x32x32xbf16, #tpu.memory_space<vmem>>, vector<1x8x32xbf16>
    %114 = vector.shape_cast %113 : vector<1x8x32xbf16> to vector<8x32xbf16>
    %cst_42 = arith.constant dense<0.000000e+00> : vector<8x32xf32>
    %115 = tpu.matmul %112, %114, %cst_42 {dimension_numbers = #tpu.dot_dimension_numbers<[1], [0], [0], [1], [0, 0, 1, 1], [], []>} : vector<8x8xbf16>, vector<8x32xbf16>, vector<8x32xf32> -> vector<8x32xf32>
    %116 = arith.addf %92, %115 : vector<8x32xf32>
    %117 = vector.extract_strided_slice %40 {offsets = [0, 0, 24], sizes = [1, 8, 8], strides = [1, 1, 1]} : vector<1x8x32xbf16> to vector<1x8x8xbf16>
    %118 = vector.extract_strided_slice %42 {offsets = [0, 0, 24], sizes = [1, 8, 8], strides = [1, 1, 1]} : vector<1x8x32xbf16> to vector<1x8x8xbf16>
    %119 = vector.extract_strided_slice %44 {offsets = [0, 0, 24], sizes = [1, 8, 8], strides = [1, 1, 1]} : vector<1x8x32xbf16> to vector<1x8x8xbf16>
    "tpu.trace_start"() <{level = 10 : i32, message = "bqd,bkd->bqk"}> : () -> ()
    %cst_43 = arith.constant dense<0.000000e+00> : vector<1x8x8xf32>
    %120 = tpu.matmul %117, %118, %cst_43 {dimension_numbers = #tpu.dot_dimension_numbers<[2], [2], [1], [1], [0, 0, 0, 1, 1, 1], [0], [0]>} : vector<1x8x8xbf16>, vector<1x8x8xbf16>, vector<1x8x8xf32> -> vector<1x8x8xf32>
    "tpu.trace_stop"() : () -> ()
    %121 = vector.shape_cast %45 : vector<8x8xf32> to vector<1x8x8xf32>
    %122 = arith.addf %120, %121 : vector<1x8x8xf32>
    %cst_44 = arith.constant dense<0xFF800000> : vector<1x8xf32>
    %123 = vector.multi_reduction <maximumf>, %122, %cst_44 [2] : vector<1x8x8xf32> to vector<1x8xf32>
    %124 = vector.shape_cast %123 : vector<1x8xf32> to vector<1x8x1xf32>
    %125 = vector.broadcast %124 : vector<1x8x1xf32> to vector<1x8x8xf32>
    %126 = arith.subf %122, %125 : vector<1x8x8xf32>
    %127 = math.exp %126 : vector<1x8x8xf32>
    %cst_45 = arith.constant dense<0.000000e+00> : vector<1x8xf32>
    %128 = vector.multi_reduction <add>, %127, %cst_45 [2] : vector<1x8x8xf32> to vector<1x8xf32>
    %129 = vector.shape_cast %128 : vector<1x8xf32> to vector<1x8x1xf32>
    %130 = tpu.reciprocal %129 {approx = true} : vector<1x8x1xf32> -> vector<1x8x1xf32>
    %131 = vector.broadcast %130 : vector<1x8x1xf32> to vector<1x8x8xf32>
    %132 = arith.mulf %127, %131 : vector<1x8x8xf32>
    %133 = arith.truncf %132 : vector<1x8x8xf32> to vector<1x8x8xbf16>
    "tpu.trace_start"() <{level = 10 : i32, message = "bqk,bkd->bqd"}> : () -> ()
    %cst_46 = arith.constant dense<0.000000e+00> : vector<1x8x8xf32>
    %134 = tpu.matmul %133, %119, %cst_46 {dimension_numbers = #tpu.dot_dimension_numbers<[2], [1], [1], [2], [0, 0, 0, 1, 1, 2], [0], [0]>} : vector<1x8x8xbf16>, vector<1x8x8xbf16>, vector<1x8x8xf32> -> vector<1x8x8xf32>
    "tpu.trace_stop"() : () -> ()
    %135 = vector.shape_cast %134 : vector<1x8x8xf32> to vector<8x8xf32>
    %136 = arith.truncf %135 : vector<8x8xf32> to vector<8x8xbf16>
    %c0_47 = arith.constant 0 : index
    %c24 = arith.constant 24 : index
    %c0_48 = arith.constant 0 : index
    %137 = vector.load %arg8[%c0_47, %c24, %c0_48] : memref<1x32x32xbf16, #tpu.memory_space<vmem>>, vector<1x8x32xbf16>
    %138 = vector.shape_cast %137 : vector<1x8x32xbf16> to vector<8x32xbf16>
    %cst_49 = arith.constant dense<0.000000e+00> : vector<8x32xf32>
    %139 = tpu.matmul %136, %138, %cst_49 {dimension_numbers = #tpu.dot_dimension_numbers<[1], [0], [0], [1], [0, 0, 1, 1], [], []>} : vector<8x8xbf16>, vector<8x32xbf16>, vector<8x32xf32> -> vector<8x32xf32>
    %140 = arith.addf %116, %139 : vector<8x32xf32>
    %141 = arith.addf %3, %140 : vector<8x32xf32>
    %c0_50 = arith.constant 0 : index
    %c0_51 = arith.constant 0 : index
    %c0_52 = arith.constant 0 : index
    %142 = vector.load %arg9[%c0_50, %c0_51, %c0_52] : memref<1x1x32xf32, #tpu.memory_space<vmem>>, vector<1x1x32xf32>
    %143 = vector.shape_cast %142 : vector<1x1x32xf32> to vector<1x32xf32>
    %144 = vector.broadcast %143 : vector<1x32xf32> to vector<8x32xf32>
    %145 = arith.addf %141, %144 : vector<8x32xf32>
    %c0_53 = arith.constant 0 : index
    %c0_54 = arith.constant 0 : index
    %c0_55 = arith.constant 0 : index
    %146 = vector.load %arg10[%c0_53, %c0_54, %c0_55] : memref<1x1x32xf32, #tpu.memory_space<vmem>>, vector<1x1x32xf32>
    %147 = vector.shape_cast %146 : vector<1x1x32xf32> to vector<1x32xf32>
    %c0_56 = arith.constant 0 : index
    %c0_57 = arith.constant 0 : index
    %c0_58 = arith.constant 0 : index
    %148 = vector.load %arg11[%c0_56, %c0_57, %c0_58] : memref<1x1x32xf32, #tpu.memory_space<vmem>>, vector<1x1x32xf32>
    %149 = vector.shape_cast %148 : vector<1x1x32xf32> to vector<1x32xf32>
    %cst_59 = arith.constant dense<0.000000e+00> : vector<8xf32>
    %150 = vector.multi_reduction <add>, %145, %cst_59 [1] : vector<8x32xf32> to vector<8xf32>
    %151 = vector.shape_cast %150 : vector<8xf32> to vector<8x1xf32>
    %cst_60 = arith.constant 3.200000e+01 : f32
    %152 = vector.broadcast %cst_60 : f32 to vector<8x1xf32>
    %153 = arith.divf %151, %152 : vector<8x1xf32>
    %154 = vector.broadcast %153 : vector<8x1xf32> to vector<8x32xf32>
    %155 = arith.subf %145, %154 : vector<8x32xf32>
    %156 = arith.mulf %155, %155 : vector<8x32xf32>
    %cst_61 = arith.constant dense<0.000000e+00> : vector<8xf32>
    %157 = vector.multi_reduction <add>, %156, %cst_61 [1] : vector<8x32xf32> to vector<8xf32>
    %158 = vector.shape_cast %157 : vector<8xf32> to vector<8x1xf32>
    %cst_62 = arith.constant 3.200000e+01 : f32
    %159 = vector.broadcast %cst_62 : f32 to vector<8x1xf32>
    %160 = arith.divf %158, %159 : vector<8x1xf32>
    %161 = vector.broadcast %153 : vector<8x1xf32> to vector<8x32xf32>
    %162 = arith.subf %145, %161 : vector<8x32xf32>
    %cst_63 = arith.constant 9.99999974E-6 : f32
    %163 = vector.broadcast %cst_63 : f32 to vector<8x1xf32>
    %164 = arith.addf %160, %163 : vector<8x1xf32>
    %165 = math.rsqrt %164 : vector<8x1xf32>
    %166 = vector.broadcast %165 : vector<8x1xf32> to vector<8x32xf32>
    %167 = arith.mulf %162, %166 : vector<8x32xf32>
    %168 = vector.broadcast %147 : vector<1x32xf32> to vector<8x32xf32>
    %169 = arith.mulf %167, %168 : vector<8x32xf32>
    %170 = vector.broadcast %149 : vector<1x32xf32> to vector<8x32xf32>
    %171 = arith.addf %169, %170 : vector<8x32xf32>
    %172 = arith.truncf %171 : vector<8x32xf32> to vector<8x32xbf16>
    %c0_64 = arith.constant 0 : index
    %c0_65 = arith.constant 0 : index
    %c0_66 = arith.constant 0 : index
    %173 = vector.load %arg12[%c0_64, %c0_65, %c0_66] : memref<1x32x128xbf16, #tpu.memory_space<vmem>>, vector<1x32x128xbf16>
    %174 = vector.shape_cast %173 : vector<1x32x128xbf16> to vector<32x128xbf16>
    %cst_67 = arith.constant dense<0.000000e+00> : vector<8x128xf32>
    %175 = tpu.matmul %172, %174, %cst_67 {dimension_numbers = #tpu.dot_dimension_numbers<[1], [0], [0], [1], [0, 0, 1, 1], [], []>} : vector<8x32xbf16>, vector<32x128xbf16>, vector<8x128xf32> -> vector<8x128xf32>
    %c0_68 = arith.constant 0 : index
    %c0_69 = arith.constant 0 : index
    %c0_70 = arith.constant 0 : index
    %176 = vector.load %arg13[%c0_68, %c0_69, %c0_70] : memref<1x1x128xf32, #tpu.memory_space<vmem>>, vector<1x1x128xf32>
    %177 = vector.shape_cast %176 : vector<1x1x128xf32> to vector<1x128xf32>
    %178 = vector.broadcast %177 : vector<1x128xf32> to vector<8x128xf32>
    %179 = arith.addf %175, %178 : vector<8x128xf32>
    %180 = arith.mulf %179, %179 : vector<8x128xf32>
    %181 = arith.mulf %179, %180 : vector<8x128xf32>
    %cst_71 = arith.constant 4.471500e-02 : f32
    %182 = vector.broadcast %cst_71 : f32 to vector<8x128xf32>
    %183 = arith.mulf %182, %181 : vector<8x128xf32>
    %184 = arith.addf %179, %183 : vector<8x128xf32>
    %cst_72 = arith.constant 0.797884583 : f32
    %185 = vector.broadcast %cst_72 : f32 to vector<8x128xf32>
    %186 = arith.mulf %185, %184 : vector<8x128xf32>
    %187 = math.tanh %186 : vector<8x128xf32>
    %cst_73 = arith.constant 1.000000e+00 : f32
    %188 = vector.broadcast %cst_73 : f32 to vector<8x128xf32>
    %189 = arith.addf %188, %187 : vector<8x128xf32>
    %cst_74 = arith.constant 5.000000e-01 : f32
    %190 = vector.broadcast %cst_74 : f32 to vector<8x128xf32>
    %191 = arith.mulf %190, %189 : vector<8x128xf32>
    %192 = arith.mulf %179, %191 : vector<8x128xf32>
    %193 = arith.truncf %192 : vector<8x128xf32> to vector<8x128xbf16>
    %c0_75 = arith.constant 0 : index
    %c0_76 = arith.constant 0 : index
    %c0_77 = arith.constant 0 : index
    %194 = vector.load %arg14[%c0_75, %c0_76, %c0_77] : memref<1x128x32xbf16, #tpu.memory_space<vmem>>, vector<1x128x32xbf16>
    %195 = vector.shape_cast %194 : vector<1x128x32xbf16> to vector<128x32xbf16>
    %cst_78 = arith.constant dense<0.000000e+00> : vector<8x32xf32>
    %196 = tpu.matmul %193, %195, %cst_78 {dimension_numbers = #tpu.dot_dimension_numbers<[1], [0], [0], [1], [0, 0, 1, 1], [], []>} : vector<8x128xbf16>, vector<128x32xbf16>, vector<8x32xf32> -> vector<8x32xf32>
    %c0_79 = arith.constant 0 : index
    %c0_80 = arith.constant 0 : index
    %c0_81 = arith.constant 0 : index
    %197 = vector.load %arg15[%c0_79, %c0_80, %c0_81] : memref<1x1x32xf32, #tpu.memory_space<vmem>>, vector<1x1x32xf32>
    %198 = vector.shape_cast %197 : vector<1x1x32xf32> to vector<1x32xf32>
    %199 = vector.broadcast %198 : vector<1x32xf32> to vector<8x32xf32>
    %200 = arith.addf %196, %199 : vector<8x32xf32>
    %201 = arith.addf %145, %200 : vector<8x32xf32>
    %c0_82 = arith.constant 0 : index
    %c0_83 = arith.constant 0 : index
    %202 = vector.load %arg18[%c0_82, %c0_83] : memref<8x32xf32, #tpu.memory_space<vmem>>, vector<8x32xf32>
    tpu.vector_store %arg18[%c0_82, %c0_83], %201 {strides = array<i32>} : memref<8x32xf32, #tpu.memory_space<vmem>>, vector<8x32xf32>,
    %c1_i32 = arith.constant 1 : i32
    %203 = arith.cmpi eq, %arg1, %c1_i32 : i32
    %204 = arith.extui %203 : i1 to i32
    %c0_i32_84 = arith.constant 0 : i32
    %205 = arith.cmpi ne, %204, %c0_i32_84 : i32
    scf.if %205 {
      %c0_85 = arith.constant 0 : index
      %c0_86 = arith.constant 0 : index
      %206 = vector.load %arg16[%c0_85, %c0_86] : memref<1x32xf32, #tpu.memory_space<vmem>>, vector<1x32xf32>
      %c0_87 = arith.constant 0 : index
      %c0_88 = arith.constant 0 : index
      %207 = vector.load %arg17[%c0_87, %c0_88] : memref<1x32xf32, #tpu.memory_space<vmem>>, vector<1x32xf32>
      %cst_89 = arith.constant dense<0.000000e+00> : vector<8xf32>
      %208 = vector.multi_reduction <add>, %201, %cst_89 [1] : vector<8x32xf32> to vector<8xf32>
      %209 = vector.shape_cast %208 : vector<8xf32> to vector<8x1xf32>
      %cst_90 = arith.constant 3.200000e+01 : f32
      %210 = vector.broadcast %cst_90 : f32 to vector<8x1xf32>
      %211 = arith.divf %209, %210 : vector<8x1xf32>
      %212 = vector.broadcast %211 : vector<8x1xf32> to vector<8x32xf32>
      %213 = arith.subf %201, %212 : vector<8x32xf32>
      %214 = arith.mulf %213, %213 : vector<8x32xf32>
      %cst_91 = arith.constant dense<0.000000e+00> : vector<8xf32>
      %215 = vector.multi_reduction <add>, %214, %cst_91 [1] : vector<8x32xf32> to vector<8xf32>
      %216 = vector.shape_cast %215 : vector<8xf32> to vector<8x1xf32>
      %cst_92 = arith.constant 3.200000e+01 : f32
      %217 = vector.broadcast %cst_92 : f32 to vector<8x1xf32>
      %218 = arith.divf %216, %217 : vector<8x1xf32>
      %219 = vector.broadcast %211 : vector<8x1xf32> to vector<8x32xf32>
      %220 = arith.subf %201, %219 : vector<8x32xf32>
      %cst_93 = arith.constant 9.99999974E-6 : f32
      %221 = vector.broadcast %cst_93 : f32 to vector<8x1xf32>
      %222 = arith.addf %218, %221 : vector<8x1xf32>
      %223 = math.rsqrt %222 : vector<8x1xf32>
      %224 = vector.broadcast %223 : vector<8x1xf32> to vector<8x32xf32>
      %225 = arith.mulf %220, %224 : vector<8x32xf32>
      %226 = vector.broadcast %206 : vector<1x32xf32> to vector<8x32xf32>
      %227 = arith.mulf %225, %226 : vector<8x32xf32>
      %228 = vector.broadcast %207 : vector<1x32xf32> to vector<8x32xf32>
      %229 = arith.addf %227, %228 : vector<8x32xf32>
      %c0_94 = arith.constant 0 : index
      %c0_95 = arith.constant 0 : index
      %230 = vector.load %arg18[%c0_94, %c0_95] : memref<8x32xf32, #tpu.memory_space<vmem>>, vector<8x32xf32>
      tpu.vector_store %arg18[%c0_94, %c0_95], %229 {strides = array<i32>} : memref<8x32xf32, #tpu.memory_space<vmem>>, vector<8x32xf32>,
    } else {
    }
    return
  }
  func.func @transform_0(%arg0: i32, %arg1: i32) -> (i32, i32) {
    %c0_i32 = arith.constant 0 : i32
    %c0_i32_0 = arith.constant 0 : i32
    return %arg0, %c0_i32 : i32, i32
  }
  func.func @transform_1(%arg0: i32, %arg1: i32) -> (i32, i32) {
    %c0_i32 = arith.constant 0 : i32
    %c0_i32_0 = arith.constant 0 : i32
    %c0_i32_1 = arith.constant 0 : i32
    return %c0_i32, %c0_i32_0 : i32, i32
  }
  func.func @transform_2(%arg0: i32, %arg1: i32) -> (i32, i32, i32) {
    %c0_i32 = arith.constant 0 : i32
    %c0_i32_0 = arith.constant 0 : i32
    %c0_i32_1 = arith.constant 0 : i32
    return %arg1, %c0_i32, %c0_i32_0 : i32, i32, i32
  }
  func.func @transform_3(%arg0: i32, %arg1: i32) -> (i32, i32, i32) {
    %c0_i32 = arith.constant 0 : i32
    %c0_i32_0 = arith.constant 0 : i32
    %c0_i32_1 = arith.constant 0 : i32
    return %arg1, %c0_i32, %c0_i32_0 : i32, i32, i32
  }
  func.func @transform_4(%arg0: i32, %arg1: i32) -> (i32, i32, i32) {
    %c0_i32 = arith.constant 0 : i32
    %c0_i32_0 = arith.constant 0 : i32
    %c0_i32_1 = arith.constant 0 : i32
    return %arg1, %c0_i32, %c0_i32_0 : i32, i32, i32
  }
  func.func @transform_5(%arg0: i32, %arg1: i32) -> (i32, i32, i32) {
    %c0_i32 = arith.constant 0 : i32
    %c0_i32_0 = arith.constant 0 : i32
    %c0_i32_1 = arith.constant 0 : i32
    return %arg1, %c0_i32, %c0_i32_0 : i32, i32, i32
  }
  func.func @transform_6(%arg0: i32, %arg1: i32) -> (i32, i32, i32) {
    %c0_i32 = arith.constant 0 : i32
    %c0_i32_0 = arith.constant 0 : i32
    %c0_i32_1 = arith.constant 0 : i32
    return %arg1, %c0_i32, %c0_i32_0 : i32, i32, i32
  }
  func.func @transform_7(%arg0: i32, %arg1: i32) -> (i32, i32, i32) {
    %c0_i32 = arith.constant 0 : i32
    %c0_i32_0 = arith.constant 0 : i32
    %c0_i32_1 = arith.constant 0 : i32
    return %arg1, %c0_i32, %c0_i32_0 : i32, i32, i32
  }
  func.func @transform_8(%arg0: i32, %arg1: i32) -> (i32, i32, i32) {
    %c0_i32 = arith.constant 0 : i32
    %c0_i32_0 = arith.constant 0 : i32
    %c0_i32_1 = arith.constant 0 : i32
    return %arg1, %c0_i32, %c0_i32_0 : i32, i32, i32
  }
  func.func @transform_9(%arg0: i32, %arg1: i32) -> (i32, i32, i32) {
    %c0_i32 = arith.constant 0 : i32
    %c0_i32_0 = arith.constant 0 : i32
    %c0_i32_1 = arith.constant 0 : i32
    return %arg1, %c0_i32, %c0_i32_0 : i32, i32, i32
  }
  func.func @transform_10(%arg0: i32, %arg1: i32) -> (i32, i32, i32) {
    %c0_i32 = arith.constant 0 : i32
    %c0_i32_0 = arith.constant 0 : i32
    %c0_i32_1 = arith.constant 0 : i32
    return %arg1, %c0_i32, %c0_i32_0 : i32, i32, i32
  }
  func.func @transform_11(%arg0: i32, %arg1: i32) -> (i32, i32, i32) {
    %c0_i32 = arith.constant 0 : i32
    %c0_i32_0 = arith.constant 0 : i32
    %c0_i32_1 = arith.constant 0 : i32
    return %arg1, %c0_i32, %c0_i32_0 : i32, i32, i32
  }
  func.func @transform_12(%arg0: i32, %arg1: i32) -> (i32, i32, i32) {
    %c0_i32 = arith.constant 0 : i32
    %c0_i32_0 = arith.constant 0 : i32
    %c0_i32_1 = arith.constant 0 : i32
    return %arg1, %c0_i32, %c0_i32_0 : i32, i32, i32
  }
  func.func @transform_13(%arg0: i32, %arg1: i32) -> (i32, i32, i32) {
    %c0_i32 = arith.constant 0 : i32
    %c0_i32_0 = arith.constant 0 : i32
    %c0_i32_1 = arith.constant 0 : i32
    return %arg1, %c0_i32, %c0_i32_0 : i32, i32, i32
  }
  func.func @transform_14(%arg0: i32, %arg1: i32) -> (i32, i32) {
    %c0_i32 = arith.constant 0 : i32
    %c0_i32_0 = arith.constant 0 : i32
    %c0_i32_1 = arith.constant 0 : i32
    return %c0_i32, %c0_i32_0 : i32, i32
  }
  func.func @transform_15(%arg0: i32, %arg1: i32) -> (i32, i32) {
    %c0_i32 = arith.constant 0 : i32
    %c0_i32_0 = arith.constant 0 : i32
    %c0_i32_1 = arith.constant 0 : i32
    return %c0_i32, %c0_i32_0 : i32, i32
  }
  func.func @transform_16(%arg0: i32, %arg1: i32) -> (i32, i32) {
    %c0_i32 = arith.constant 0 : i32
    %c0_i32_0 = arith.constant 0 : i32
    return %arg0, %c0_i32 : i32, i32
  }
}

</mosaic_0001>

<bundles_post_ra>
// kernel: frozen_openclip_embedder.1
= control target key start
LH: loop header
LB: loop body
LE: loop exit
PB: predicated region body
PF: predicated region fallthrough
CT: control target
= control target key end

     0   :  { %s1833_s21 = smov 0   ;;  %s1835_s22 = smov 0   ;;  %s2099_s0 = inlined_call_operand.vmem [shape: f32[16,32], index: 0, kind: input, shape index: {}, may-alias: {0,16}]   ;;  %s2100_s1 = inlined_call_operand.vmem [shape: f32[8,8], index: 1, kind: input, shape index: {}]   ;;  %s2101_s2 = inlined_call_operand.vmem [shape: f32[2,1,32], index: 2, kind: input, shape index: {}]   ;;  %s2102_s3 = inlined_call_operand.vmem [shape: f32[2,1,32], index: 3, kind: input, shape index: {}]   ;;  %s2103_s4 = inlined_call_operand.vmem [shape: bf16[2,32,96], index: 4, kind: input, shape index: {}]   ;;  %s2104_s5 = inlined_call_operand.vmem [shape: f32[2,1,96], index: 5, kind: input, shape index: {}]   ;;  %s2105_s6 = inlined_call_operand.vmem [shape: bf16[2,32,32], index: 6, kind: input, shape index: {}]   ;;  %s2106_s7 = inlined_call_operand.vmem [shape: f32[2,1,32], index: 7, kind: input, shape index: {}]   ;;  %s2107_s8 = inlined_call_operand.vmem [shape: f32[2,1,32], index: 8, kind: input, shape index: {}]   ;;  %s2108_s9 = inlined_call_operand.vmem [shape: f32[2,1,32], index: 9, kind: input, shape index: {}]   ;;  %s2109_s10 = inlined_call_operand.vmem [shape: bf16[2,32,128], index: 10, kind: input, shape index: {}]   ;;  %s2110_s11 = inlined_call_operand.vmem [shape: f32[2,1,128], index: 11, kind: input, shape index: {}]   ;;  %s2111_s12 = inlined_call_operand.vmem [shape: bf16[2,128,32], index: 12, kind: input, shape index: {}]   ;;  %s2112_s13 = inlined_call_operand.vmem [shape: f32[2,1,32], index: 13, kind: input, shape index: {}]   ;;  %s2113_s14 = inlined_call_operand.vmem [shape: f32[1,32], index: 14, kind: input, shape index: {}]   ;;  %s2114_s15 = inlined_call_operand.vmem [shape: f32[1,32], index: 15, kind: input, shape index: {}]   ;;  %s2115_s16 = inlined_call_operand.vmem [shape: f32[16,32], index: 16, kind: output, shape index: {}, may-alias: {0,16}]  }
   0x1   :  { %2120 = sst [smem:[#allocation8_spill]] %s2099_s0  ;;  %s1837_s23 = smov 0  }
   0x2   :  { %2121 = sst [smem:[#allocation9_spill]] %s2100_s1  ;;  %s1839_s24 = smov 0  }
   0x3   :  { %2122 = sst [smem:[#allocation10_spill]] %s2102_s3  ;;  %s1841_s25 = smov 0  }
   0x4   :  { %2123 = sst [smem:[#allocation11_spill]] %s2103_s4 }
   0x5   :  { %2124 = sst [smem:[#allocation12_spill]] %s2105_s6 }
   0x6   :  { %2125 = sst [smem:[#allocation13_spill]] %s2113_s14 }
   0x7   :  { %2126 = sst [smem:[#allocation14_spill]] %s2114_s15 }
   0x8   :  { %2127 = sst [smem:[#allocation15_spill]] %s2115_s16 }
   0x9 LB: > { %2128 = sst [smem:[#allocation2_spill]] %s1718_s21  ;;  %s35_s26 = sadd.s32 1, %s1726_s23  ;;  %s1734_s25 = sphi %s1841_s25, %s26_s25   ;;  %s1730_s24 = sphi %s1839_s24, %s2155_s24   ;;  %s1726_s23 = sphi %s1837_s23, %s2154_s23   ;;  %s1722_s22 = sphi %s1835_s22, %s2153_s22   ;;  %s1718_s21 = sphi %s1833_s21, %s2152_s21  }
   0xa   : > { %2129 = sst [smem:[#allocation3_spill]] %s1726_s23  ;;  %s38_s27 = sadd.s32 1, %s1730_s24 }
   0xb   : > { %2130 = sst [smem:[#allocation4_spill]] %s1730_s24  ;;  %p36_p0 = scmp.ge.s32.totalorder %s35_s26, 2 }
   0xc   : > { %2131 = sst [smem:[#allocation5_spill]] %s1734_s25  ;;  %p1515_p1 = scmp.ge.s32.totalorder %s1734_s25, 1 }
   0xd   : > { %p577_p2 = scmp.lt.s32.totalorder %s1734_s25, 5  ;;  %s2157_s26 = smov (%p36_p0, %s35_s26), 0 }
   0xe   : > { %2132 = sst [smem:[#allocation6_spill]] %s2157_s26  ;;  %s2159_s27 = smov (!%p36_p0, %s38_s27), %s1730_s24 }
   0xf   : > { %p578_p3 = pnand %p1515_p1, %p577_p2  ;;  %p40_p4 = scmp.ge.s32.totalorder %s2159_s27, 2 }
  0x10   : > { %p669_p5 = scmp.lt.s32.totalorder (!%p578_p3), %s1722_s22, 1  ;;  %p673_p6 = scmp.lt.s32.totalorder (!%p578_p3), %s1718_s21, 1 }
  0x11   : > { %s2161_s27 = smov (%p40_p4, %s2159_s27), 0  ;;  %581 = sbr.rel (%p578_p3) target bundleno = 2602 (0xa2a), region = 84 }
  0x12   : > { %2133 = sst [smem:[#allocation7_spill]] %s2161_s27 }
  0x13   : > { %s2134_s17 = sld [smem:[#allocation8_spill]] (!%p578_p3) }
  0x14   : > { %s2136_s4 = sld [smem:[#allocation11_spill]] (!%p578_p3) }
  0x15   : > { %s2137_s6 = sld [smem:[#allocation12_spill]] (!%p578_p3) }
  0x16   : > { %s2163_s22 = smov (!%p669_p5, %s1722_s22), 1 }
  0x17   : > { %s1867_s28 = scalar_select %p673_p6, %s1718_s21, 1 }
  0x18   : > { %s1516_s29 = sshll.u32 %s2163_s22, 3 }
  0x19   : > { %s672_s18 = scalar_lea.vmem %s2134_s17, %s1516_s29  ;;  %s1592_s25 = sshll.u32 %s1867_s28, 4 }
  0x1a   : > { %s1884_s1 = scalar_lea.vmem %s2136_s4, %s1592_s25  ;;  %s1910_s22 = scalar_lea.vmem %s2109_s10, %s1592_s25 }
  0x1b   : > { %s1893_s17 = scalar_lea.vmem %s2137_s6, %s1592_s25  ;;  %s708_s16 = scalar_lea.vmem %s2110_s11, %s1867_s28 }
  0x1c   : > { %s1595_s6 = sshll.u32 %s1867_s28, 6  ;;  %s716_s24 = scalar_lea.vmem %s2112_s13, %s1867_s28 }
  0x1d   : > { %s1924_s27 = scalar_lea.vmem %s2111_s12, %s1595_s6  ;;  %s2138_s4 = sld [smem:[#allocation15_spill]] }
  0x1e   : > { %s2139_s25 = sld [smem:[#allocation2_spill]] }
  0x23   : > { %s1929_s3 = scalar_lea.vmem %s2138_s4, %s1516_s29 }
  0x24   : > { %p1526_p7 = scmp.ne.s32.totalorder %s2139_s25, 0 }
  0x26   : > { %725 = sbr.rel (%p1526_p7) target bundleno = 45 (0x2d), region = 88 }
  0x2b   : > { %v726_v0 = vld [vmem:[%s672_s18] sm:$0xff]  ;;  %vm727_vm0 = vcmask 261120  }
  0x2c   : > { %728 = vst.msk [vmem:[%s1929_s3] sm:$0xff] %vm727_vm0, %v726_v0 }
  0x2d PF: > { %vm732_vm1 = vcmask 261120   ;;  %v1736_v3 = vmov 32.0   ;;  %v1597_v15 = vld [vmem:[%s1884_s1 + $0x8] sm:$0xff]  ;;  %v1596_v16 = vld [vmem:[%s1884_s1] sm:$0xff]  ;;  %s2140_s1 = scalar_lea.vmem %s2101_s2, %s1867_s28  ;;  %s2141_s21 = sld [smem:[#allocation10_spill]]  ;;  %vm814_vm6 = vcmask 64512  }
  0x2e   : > { %1668 = vrcp.f32 %v1736_v3  ;;  %800 = vmatpush.bf16.msra.mxu0 %v1597_v15  ;;  %v1660_v26 = vld [vmem:[%s2140_s1] ss:$0 sm:$0xff]  ;;  %s2143_s20 = scalar_lea.vmem %s2104_s5, %s1867_s28  ;;  %s1737_s23 = smov 88   ;;  %vm851_vm7 = vcmask 1043456  }
  0x2f   : > { %v1662_v33 = vld [vmem:[%s2143_s20] ss:$0 sm:$0xff]  ;;  %s1738_s26 = smov 96   ;;  %s1739_s14 = smov 80  }
  0x30   : > { %s1740_s15 = smov 112   ;;  %s2144_s6 = sld [smem:[#allocation9_spill]]  ;;  %v869_v56 = vld [vmem:[%s1893_s17] sm:$0xf] }
  0x31   : > { %s1741_s1 = smov 64   ;;  %s1742_s29 = smov 120   ;;  %v951_v57 = vsel %vm851_vm7, %v869_v56, 0  ;;  %v1023_v56 = vld [vmem:[%s1893_s17 + $0x8] sm:$0xf] }
  0x32   : > { %801 = vmatpush.bf16.msra.mxu0 %v1596_v16  ;;  %s1743_s18 = smov 72   ;;  %960 = vmatpush.bf16.msra.mxu1 %v951_v57  ;;  %s1746_s0 = smov 56   ;;  %v1028_v57 = vsel %vm851_vm7, %v1023_v56, 0 }
  0x33   : > { %v1934_v1 = vld [vmem:[%s1929_s3] sm:$0xff]  ;;  %s2142_s30 = scalar_lea.vmem %s2141_s21, %s1867_s28  ;;  %s1744_s21 = smov 104  }
  0x34   : > { %v733_v2 = vsel %vm732_vm1, %v1934_v1, 0.0  ;;  %v1669_v4 = vpop.eup %1668  ;;  %v1661_v29 = vld [vmem:[%s2142_s30] ss:$0 sm:$0xff]  ;;  %s1745_s30 = smov 40   ;;  %s1747_s19 = smov 48  }
  0x35   : > { %734 = vadd.xlane.f32.xlu0 %v733_v2  ;;  %v737_v5 = vmul.f32 32.0, %v1669_v4  ;;  %vm741_vm2 = vweird.f32 %v1669_v4  ;;  %s2147_s4 = scalar_lea.vmem %s2108_s9, %s1867_s28 }
  0x36   : > { %v1975_v46 = vld [vmem:[%s2144_s6] sm:$0xff] }
  0x37   : > { %v738_v6 = vsub.f32 1.0, %v737_v5 }
  0x39   : > { %v739_v7 = vmul.f32 %v1669_v4, %v738_v6 }
  0x3b   : > { %v740_v8 = vadd.f32 %v1669_v4, %v739_v7 }
  0x3d   : > { %v1938_v9 = vsel %vm741_vm2, %v1669_v4, %v740_v8 }
  0xa8   : > { %v735_v10 = vpop.xlane.xlu0 %734 }
  0xa9   : > { %v743_v11 = vmul.f32 %v1938_v9, %v735_v10 }
  0xab   : > { %v744_v12 = vsub.f32 %v1934_v1, %v743_v11 }
  0xad   : > { %v745_v13 = vmul.f32 %v744_v12, %v744_v12 }
  0xaf   : > { %v746_v14 = vsel %vm732_vm1, %v745_v13, 0.0 }
  0xb0   : > { %747 = vadd.xlane.f32.xlu0 %v746_v14 }
 0x123   : > { %v748_v17 = vpop.xlane.xlu0 %747 }
 0x124   : > { %v749_v18 = vmul.f32 %v748_v17, %v1938_v9 }
 0x126   : > { %v750_v19 = vadd.f32 1e-05, %v749_v18 }
 0x128   : > { %1670 = vrsqrt.f32 %v750_v19  ;;  %vm757_vm4 = vweird.f32 %v750_v19 }
 0x12e   : > { %v1671_v20 = vpop.eup %1670 }
 0x12f   : > { %v752_v21 = vmul.f32 %v1671_v20, %v750_v19  ;;  %vm758_vm3 = vweird.f32 %v1671_v20 }
 0x130   : > { %vm759_vm5 = vmor %vm757_vm4, %vm758_vm3 }
 0x131   : > { %v753_v22 = vmul.f32 %v1671_v20, %v752_v21 }
 0x133   : > { %v754_v23 = vmul.f32 0.5, %v753_v22 }
 0x135   : > { %v755_v24 = vsub.f32 1.5, %v754_v23 }
 0x137   : > { %v756_v25 = vmul.f32 %v1671_v20, %v755_v24 }
 0x139   : > { %v760_v27 = vsel %vm759_vm5, %v1671_v20, %v756_v25 }
 0x13a   : > { %v761_v28 = vmul.f32 %v760_v27, %v744_v12 }
 0x13c   : > { %v765_v30 = vmul.f32 %v1660_v26, %v761_v28 }
 0x13e   : > { %v769_v31 = vadd.f32 %v1661_v29, %v765_v30 }
 0x140   : > { %v770_v32 = vpack.c.bf16 %v769_v31, %v769_v31 }
 0x142   : > { %1535 = vmatmul.msk.bf16.vlgmr.msra.gmra.mxu0 %vm732_vm1, %v770_v32 }
 0x1bf   : > { %v803_v34 = vpop.f32.mrf.mxu0 }
 0x1c0   : > { %v804_v35 = vadd.f32 %v1662_v33, %v803_v34 }
 0x1c2   : > { %v807_v36 = vpack.c.bf16 %v804_v35, %v804_v35 }
 0x1c4   : > { %v810_v37 = vunpack.c.l.b16 %v807_v36 }
 0x1c6   : > { %v1962_v38 = vpack.c.b16 %v810_v37, %v810_v37 }
 0x1c7   : > { %v805_v39 = vpop.f32.mrf.mxu0 }
 0x1c8   : > { %872 = vrot.lane.b32.xlu0 %v1962_v38, %s1737_s23  ;;  %812 = vrot.lane.b32.xlu1 %v1962_v38, %s1738_s26  ;;  %s2145_s23 = scalar_lea.vmem %s2106_s7, %s1867_s28 }
 0x1d0   : > { %968 = vrot.lane.b32.xlu0 %v1962_v38, %s1739_s14  ;;  %s2146_s14 = scalar_lea.vmem %s2107_s8, %s1867_s28 }
 0x1d8   : > { %966 = vrot.lane.b32.xlu0 %v1962_v38, %s1740_s15 }
 0x23a   : > { %v873_v40 = vpop.permute.xlu0 %872  ;;  %v813_v41 = vpop.permute.xlu1 %812 }
 0x23b   : > { %v819_v42 = vsel %vm814_vm6, %v813_v41, 0  ;;  %v878_v43 = vsel %vm814_vm6, %v873_v40, 0 }
 0x23c   : > { %828 = vmatpush.bf16.xpose.msra.mxu3 %v819_v42 }
 0x242   : > { %v969_v44 = vpop.permute.xlu0 %968 }
 0x243   : > { %v974_v45 = vsel %vm814_vm6, %v969_v44, 0  ;;  %1536 = vmatmul.msk.bf16.vlgmr.msra.gmra.mxu3 %vm814_vm6, %v807_v36 }
 0x244   : > { %887 = vmatpush.bf16.xpose.msrb.mxu3 %v878_v43 }
 0x24a   : > { %v967_v4 = vpop.permute.xlu0 %966 }
 0x24c   : > { %983 = vmatpush.bf16.xpose.msra.mxu3 %v974_v45 }
 0x2c6   : > { %v830_v47 = vpop.f32.mrf.mxu3 }
 0x2c7   : > { %v831_v48 = vadd.f32 %v830_v47, %v1975_v46 }
 0x2c9   : > { %v834_v49 = vsel %vm814_vm6, %v831_v48, -inf }
 0x2ca   : > { %835 = vmax.xlane.f32.xlu1 %v834_v49 }
 0x2ce   : > { %v832_v50 = vpop.f32.mrf.mxu3 }
 0x33d   : > { %v836_v51 = vpop.xlane.xlu1 %835 }
 0x33e   : > { %v837_v52 = vsub.f32 %v831_v48, %v836_v51 }
 0x340   : > { %v838_v53 = vmul.f32 1.442695, %v837_v52 }
 0x342   : > { %1672 = vpow2.f32 %v838_v53  ;;  %v927_v53 = vld [vmem:[%s1893_s17 + $0x4] sm:$0xf] }
 0x348   : > { %v1673_v54 = vpop.eup %1672 }
 0x349   : > { %v840_v55 = vsel %vm814_vm6, %v1673_v54, 0.0 }
 0x34a   : > { %841 = vadd.xlane.f32.xlu2 %v840_v55 }
 0x362   : > { %846 = vrot.lane.b32.xlu2 %v1962_v38, %s1741_s1 }
 0x36a   : > { %870 = vrot.lane.b32.xlu2 %v1962_v38, %s1742_s29 }
 0x372   : > { %1046 = vrot.lane.b32.xlu2 %v1962_v38, %s1743_s18 }
 0x37a   : > { %1044 = vrot.lane.b32.xlu2 %v1962_v38, %s1744_s21 }
 0x3bd   : > { %v842_v58 = vpop.xlane.xlu2 %841 }
 0x3be   : > { %1674 = vrcp.f32 %v842_v58 }
 0x3c4   : > { %v1675_v59 = vpop.eup %1674 }
 0x3c5   : > { %v847_v60 = vpop.permute.xlu2 %846  ;;  %v844_v61 = vmul.f32 %v1675_v59, %v1673_v54  ;;  %v932_v54 = vsel %vm851_vm7, %v927_v53, 0  ;;  %v1666_v53 = vld [vmem:[%s708_s16] ss:$0 sm:$0xff]  ;;  %s2148_s16 = sld [smem:[#allocation2_spill]] }
 0x3c6   : > { %v853_v62 = vsel %vm851_vm7, %v847_v60, 0  ;;  %941 = vmatpush.bf16.msrb.mxu0 %v932_v54 }
 0x3c7   : > { %862 = vmatpush.bf16.msra.mxu2 %v853_v62  ;;  %v845_v63 = vpack.c.bf16 %v844_v61, %v844_v61  ;;  %v1101_v61 = vld [vmem:[%s1893_s17 + $0xc] sm:$0xf] }
 0x3c8   : > { %v1106_v62 = vsel %vm851_vm7, %v1101_v61, 0 }
 0x3ca   : > { %1537 = vmatmul.msk.bf16.vlgmr.msra.gmra.mxu2 %vm814_vm6, %v845_v63  ;;  %1037 = vmatpush.bf16.msra.mxu0 %v1028_v57 }
 0x3cb   : > { %p1589_p8 = scmp.ne.s32.totalorder %s2148_s16, 1 }
 0x3cc   : > { %s2149_s18 = sld [smem:[#allocation13_spill]] (!%p1589_p8) }
 0x3cd   : > { %v871_v0 = vpop.permute.xlu2 %870 }
 0x3ce   : > { %1538 = vmatmul.msk.bf16.vlgmr.msrb.gmra.mxu3 %vm814_vm6, %v871_v0 }
 0x3d5   : > { %v1047_v2 = vpop.permute.xlu2 %1046 }
 0x3d6   : > { %v1052_v3 = vsel %vm814_vm6, %v1047_v2, 0 }
 0x3d7   : > { %1061 = vmatpush.bf16.xpose.msrb.mxu1 %v1052_v3 }
 0x3dd   : > { %v1045_v13 = vpop.permute.xlu2 %1044 }
 0x3de   : > { %1542 = vmatmul.msk.bf16.vlgmr.msra.gmra.mxu3 %vm814_vm6, %v967_v4 }
 0x44d   : > { %v864_v5 = vpop.f32.mrf.mxu2 }
 0x44e   : > { %v868_v6 = vpack.c.bf16 %v864_v5, %v864_v5 }
 0x450   : > { %1541 = vmatmul.msk.bf16.vlgmr.msra.gmra.mxu1 %vm814_vm6, %v868_v6 }
 0x451   : > { %v889_v7 = vpop.f32.mrf.mxu3 }
 0x452   : > { %v890_v8 = vadd.f32 %v889_v7, %v1975_v46 }
 0x454   : > { %v893_v10 = vsel %vm814_vm6, %v890_v8, -inf }
 0x455   : > { %v866_v11 = vpop.f32.mrf.mxu2  ;;  %894 = vmax.xlane.f32.xlu1 %v893_v10 }
 0x459   : > { %v891_v12 = vpop.f32.mrf.mxu3 }
 0x460   : > { %1545 = vmatmul.msk.bf16.vlgmr.msrb.gmra.mxu1 %vm814_vm6, %v1045_v13 }
 0x461   : > { %v985_v14 = vpop.f32.mrf.mxu3 }
 0x462   : > { %v986_v15 = vadd.f32 %v985_v14, %v1975_v46 }
 0x464   : > { %v989_v16 = vsel %vm814_vm6, %v986_v15, -inf }
 0x465   : > { %990 = vmax.xlane.f32.xlu2 %v989_v16 }
 0x469   : > { %v987_v17 = vpop.f32.mrf.mxu3 }
 0x47d   : > { %1079 = vrot.lane.b32.xlu2 %v1962_v38, %s1745_s30 }
 0x4c8   : > { %v895_v18 = vpop.xlane.xlu1 %894 }
 0x4c9   : > { %v896_v19 = vsub.f32 %v890_v8, %v895_v18  ;;  %v1663_v18 = vld [vmem:[%s2145_s23] ss:$0 sm:$0xff] }
 0x4cb   : > { %v897_v20 = vmul.f32 1.442695, %v896_v19 }
 0x4cd   : > { %1676 = vpow2.f32 %v897_v20  ;;  %v1998_v21 = vpop.f32.mrf.mxu1 }
 0x4d3   : > { %v1677_v22 = vpop.eup %1676 }
 0x4d4   : > { %v899_v23 = vsel %vm814_vm6, %v1677_v22, 0.0 }
 0x4d5   : > { %v964_v24 = vpop.f32.mrf.mxu1  ;;  %900 = vadd.xlane.f32.xlu1 %v899_v23 }
 0x4d8   : > { %v991_v25 = vpop.xlane.xlu2 %990 }
 0x4d9   : > { %v992_v26 = vsub.f32 %v986_v15, %v991_v25 }
 0x4db   : > { %v993_v27 = vmul.f32 1.442695, %v992_v26 }
 0x4dd   : > { %v1063_v28 = vpop.f32.mrf.mxu1  ;;  %1678 = vpow2.f32 %v993_v27 }
 0x4de   : > { %v1064_v29 = vadd.f32 %v1063_v28, %v1975_v46  ;;  %v1599_v28 = vld [vmem:[%s1910_s22 + $0x8] sm:$0xff] }
 0x4e0   : > { %v1080_v30 = vpop.permute.xlu2 %1079  ;;  %v1067_v31 = vsel %vm814_vm6, %v1064_v29, -inf }
 0x4e1   : > { %v1085_v32 = vsel %vm851_vm7, %v1080_v30, 0  ;;  %1068 = vmax.xlane.f32.xlu0 %v1067_v31 }
 0x4e2   : > { %1094 = vmatpush.bf16.msrb.mxu3 %v1085_v32 }
 0x4e3   : > { %v1679_v33 = vpop.eup %1678 }
 0x4e4   : > { %v995_v35 = vsel %vm814_vm6, %v1679_v33, 0.0 }
 0x4e5   : > { %v1065_v34 = vpop.f32.mrf.mxu1 }
 0x4e9   : > { %996 = vadd.xlane.f32.xlu0 %v995_v35 }
 0x4ee   : > { %905 = vrot.lane.b32.xlu1 %v1962_v38, %s1746_s0  ;;  %s2150_s0 = sld [smem:[#allocation14_spill]] (!%p1589_p8) }
 0x4fd   : > { %1001 = vrot.lane.b32.xlu0 %v1962_v38, %s1747_s19 }
 0x548   : > { %v901_v36 = vpop.xlane.xlu1 %900 }
 0x549   : > { %1680 = vrcp.f32 %v901_v36 }
 0x54f   : > { %v1681_v41 = vpop.eup %1680 }
 0x550   : > { %v903_v43 = vmul.f32 %v1681_v41, %v1677_v22 }
 0x552   : > { %v904_v38 = vpack.c.bf16 %v903_v43, %v903_v43  ;;  %v1665_v43 = vld [vmem:[%s2147_s4] ss:$0 sm:$0xff] }
 0x554   : > { %v1069_v37 = vpop.xlane.xlu0 %1068 }
 0x555   : > { %v1070_v39 = vsub.f32 %v1064_v29, %v1069_v37  ;;  %v1598_v29 = vld [vmem:[%s1910_s22] sm:$0xff] }
 0x557   : > { %v1071_v40 = vmul.f32 1.442695, %v1070_v39 }
 0x559   : > { %1682 = vpow2.f32 %v1071_v40  ;;  %v1664_v40 = vld [vmem:[%s2146_s14] ss:$0 sm:$0xff] }
 0x55c   : > { %v997_v47 = vpop.xlane.xlu0 %996 }
 0x55d   : > { %1684 = vrcp.f32 %v997_v47  ;;  %v1606_v47 = vld [vmem:[%s1924_s27 + $0x30] sm:$0xff] }
 0x55f   : > { %v1683_v42 = vpop.eup %1682 }
 0x560   : > { %v906_v44 = vpop.permute.xlu1 %905  ;;  %v1073_v45 = vsel %vm814_vm6, %v1683_v42, 0.0 }
 0x561   : > { %1074 = vadd.xlane.f32.xlu1 %v1073_v45  ;;  %v911_v46 = vsel %vm851_vm7, %v906_v44, 0 }
 0x562   : > { %920 = vmatpush.bf16.msrb.mxu2 %v911_v46 }
 0x563   : > { %v1685_v48 = vpop.eup %1684 }
 0x564   : > { %v999_v49 = vmul.f32 %v1685_v48, %v1679_v33  ;;  %v1604_v48 = vld [vmem:[%s1924_s27 + $0x20] sm:$0xff] }
 0x565   : > { %1539 = vmatmul.msk.bf16.vlgmr.msrb.gmra.mxu2 %vm814_vm6, %v904_v38  ;;  %v1605_v38 = vld [vmem:[%s1924_s27 + $0x28] sm:$0xff] }
 0x566   : > { %v1000_v52 = vpack.c.bf16 %v999_v49, %v999_v49  ;;  %v1603_v49 = vld [vmem:[%s1924_s27 + $0x18] sm:$0xff] }
 0x56f   : > { %v1002_v50 = vpop.permute.xlu0 %1001 }
 0x570   : > { %v1007_v51 = vsel %vm851_vm7, %v1002_v50, 0  ;;  %v1602_v50 = vld [vmem:[%s1924_s27 + $0x10] sm:$0xff] }
 0x571   : > { %1016 = vmatpush.bf16.msra.mxu2 %v1007_v51  ;;  %v1601_v51 = vld [vmem:[%s1924_s27 + $0x8] sm:$0xff] }
 0x575   : > { %1543 = vmatmul.msk.bf16.vlgmr.msra.gmra.mxu2 %vm814_vm6, %v1000_v52  ;;  %v1600_v52 = vld [vmem:[%s1924_s27] sm:$0xff] }
 0x576   : > { %1115 = vmatpush.bf16.msrb.mxu2 %v1106_v62 }
 0x5d4   : > { %v1075_v55 = vpop.xlane.xlu1 %1074 }
 0x5d5   : > { %1686 = vrcp.f32 %v1075_v55 }
 0x5db   : > { %v1687_v58 = vpop.eup %1686 }
 0x5dc   : > { %v1077_v59 = vmul.f32 %v1687_v58, %v1683_v42 }
 0x5de   : > { %v1078_v60 = vpack.c.bf16 %v1077_v59, %v1077_v59 }
 0x5e0   : > { %1546 = vmatmul.msk.bf16.vlgmr.msrb.gmra.mxu3 %vm814_vm6, %v1078_v60 }
 0x5e8   : > { %v922_v63 = vpop.f32.mrf.mxu2 }
 0x5e9   : > { %v926_v0 = vpack.c.bf16 %v922_v63, %v922_v63 }
 0x5eb   : > { %1540 = vmatmul.msk.bf16.vlgmr.msrb.gmra.mxu0 %vm814_vm6, %v926_v0 }
 0x5ec   : > { %1190 = vmatpush.bf16.msrb.mxu0 %v1599_v28 }
 0x5f0   : > { %v924_v2 = vpop.f32.mrf.mxu2  ;;  %1191 = vmatpush.bf16.msrb.mxu0 %v1598_v29 }
 0x5f8   : > { %v1018_v3 = vpop.f32.mrf.mxu2 }
 0x5f9   : > { %v1022_v4 = vpack.c.bf16 %v1018_v3, %v1018_v3 }
 0x5fb   : > { %1544 = vmatmul.msk.bf16.vlgmr.msra.gmra.mxu0 %vm814_vm6, %v1022_v4  ;;  %v1667_v4 = vld [vmem:[%s716_s24] ss:$0 sm:$0xff] }
 0x600   : > { %v1020_v5 = vpop.f32.mrf.mxu2 }
 0x663   : > { %v1096_v6 = vpop.f32.mrf.mxu3 }
 0x664   : > { %v1100_v7 = vpack.c.bf16 %v1096_v6, %v1096_v6 }
 0x666   : > { %1547 = vmatmul.msk.bf16.vlgmr.msrb.gmra.mxu2 %vm814_vm6, %v1100_v7 }
 0x668   : > { %v943_v8 = vpop.f32.mrf.mxu0 }
 0x669   : > { %v963_v12 = vadd.f32 %v1998_v21, %v943_v8 }
 0x66b   : > { %v1098_v10 = vpop.f32.mrf.mxu3 }
 0x670   : > { %v945_v11 = vpop.f32.mrf.mxu0 }
 0x678   : > { %v1039_v13 = vpop.f32.mrf.mxu0 }
 0x679   : > { %v1043_v14 = vadd.f32 %v1039_v13, %v963_v12 }
 0x680   : > { %v1041_v15 = vpop.f32.mrf.mxu0 }
 0x6e9   : > { %v1117_v16 = vpop.f32.mrf.mxu2 }
 0x6ea   : > { %v1121_v17 = vadd.f32 %v1117_v16, %v1043_v14 }
 0x6ec   : > { %v1122_v19 = vadd.f32 %v1121_v17, %v1934_v1  ;;  %v1607_v1 = vld [vmem:[%s1924_s27 + $0x38] sm:$0xff] }
 0x6ed   : > { %1275 = vmatpush.bf16.msra.mxu1 %v1607_v1 }
 0x6ee   : > { %v2029_v20 = vadd.f32 %v1663_v18, %v1122_v19 }
 0x6f0   : > { %v1130_v21 = vsel %vm732_vm1, %v2029_v20, 0.0 }
 0x6f1   : > { %1131 = vadd.xlane.f32.xlu2 %v1130_v21  ;;  %v1119_v22 = vpop.f32.mrf.mxu2  ;;  %1276 = vmatpush.bf16.msra.mxu1 %v1606_v47 }
 0x6f5   : > { %1277 = vmatpush.bf16.msra.mxu1 %v1605_v38 }
 0x6f9   : > { %1278 = vmatpush.bf16.msra.mxu1 %v1604_v48 }
 0x6fd   : > { %1279 = vmatpush.bf16.msra.mxu1 %v1603_v49 }
 0x701   : > { %1280 = vmatpush.bf16.msra.mxu1 %v1602_v50 }
 0x705   : > { %1281 = vmatpush.bf16.msra.mxu1 %v1601_v51 }
 0x709   : > { %1282 = vmatpush.bf16.msra.mxu1 %v1600_v52 }
 0x764   : > { %v1132_v23 = vpop.xlane.xlu2 %1131 }
 0x765   : > { %v1133_v24 = vmul.f32 %v1132_v23, %v1938_v9 }
 0x767   : > { %v1134_v25 = vsub.f32 %v2029_v20, %v1133_v24 }
 0x769   : > { %v1135_v26 = vmul.f32 %v1134_v25, %v1134_v25 }
 0x76b   : > { %v1136_v27 = vsel %vm732_vm1, %v1135_v26, 0.0 }
 0x76c   : > { %1137 = vadd.xlane.f32.xlu0 %v1136_v27 }
 0x7df   : > { %v1138_v30 = vpop.xlane.xlu0 %1137 }
 0x7e0   : > { %v1139_v31 = vmul.f32 %v1138_v30, %v1938_v9 }
 0x7e2   : > { %v1140_v32 = vadd.f32 1e-05, %v1139_v31 }
 0x7e4   : > { %1688 = vrsqrt.f32 %v1140_v32  ;;  %vm1147_vm9 = vweird.f32 %v1140_v32 }
 0x7ea   : > { %v1689_v33 = vpop.eup %1688 }
 0x7eb   : > { %v1142_v34 = vmul.f32 %v1689_v33, %v1140_v32  ;;  %vm1148_vm8 = vweird.f32 %v1689_v33 }
 0x7ec   : > { %vm1149_vm10 = vmor %vm1147_vm9, %vm1148_vm8 }
 0x7ed   : > { %v1143_v35 = vmul.f32 %v1689_v33, %v1142_v34 }
 0x7ef   : > { %v1144_v36 = vmul.f32 0.5, %v1143_v35 }
 0x7f1   : > { %v1145_v37 = vsub.f32 1.5, %v1144_v36 }
 0x7f3   : > { %v1146_v39 = vmul.f32 %v1689_v33, %v1145_v37 }
 0x7f5   : > { %v1150_v41 = vsel %vm1149_vm10, %v1689_v33, %v1146_v39 }
 0x7f6   : > { %v1151_v42 = vmul.f32 %v1150_v41, %v1134_v25 }
 0x7f8   : > { %v1155_v44 = vmul.f32 %v1664_v40, %v1151_v42 }
 0x7fa   : > { %v1159_v45 = vadd.f32 %v1665_v43, %v1155_v44 }
 0x7fc   : > { %v1160_v46 = vpack.c.bf16 %v1159_v45, %v1159_v45 }
 0x7fe   : > { %1556 = vmatmul.msk.bf16.vlgmr.msrb.gmra.mxu0 %vm732_vm1, %v1160_v46 }
 0x87b   : > { %v1193_v54 = vpop.f32.mrf.mxu0 }
 0x87c   : > { %v1194_v55 = vadd.f32 %v1666_v53, %v1193_v54 }
 0x87e   : > { %v1197_v56 = vmul.f32 %v1194_v55, %v1194_v55 }
 0x880   : > { %v1198_v57 = vmul.f32 %v1197_v56, %v1194_v55 }
 0x882   : > { %v1199_v58 = vmul.f32 0.044715, %v1198_v57 }
 0x883   : > { %v1195_v59 = vpop.f32.mrf.mxu0 }
 0x884   : > { %v1200_v60 = vadd.f32 %v1199_v58, %v1194_v55 }
 0x886   : > { %v1201_v61 = vmul.f32 0.7978846, %v1200_v60 }
 0x888   : > { %1690 = vtanh.f32 %v1201_v61 }
 0x88e   : > { %v1691_v62 = vpop.eup %1690 }
 0x88f   : > { %v1203_v63 = vadd.f32 1.0, %v1691_v62 }
 0x891   : > { %v1204_v0 = vmul.f32 0.5, %v1203_v63 }
 0x893   : > { %v1205_v2 = vmul.f32 %v1204_v0, %v1194_v55 }
 0x895   : > { %v1206_v3 = vpack.c.bf16 %v1205_v2, %v1205_v2 }
 0x897   : > { %1283 = vmatmul.bf16.vlgmr.msra.gmra.mxu1 %v1206_v3 }
 0x914   : > { %v1284_v5 = vpop.f32.mrf.mxu1 }
 0x915   : > { %v1285_v6 = vadd.f32 %v1667_v4, %v1284_v5 }
 0x917   : > { %v1288_v7 = vadd.f32 %v1285_v6, %v2029_v20 }
 0x918   : > { %1293 = sbr.rel (%p1589_p8) target bundleno = 2602 (0xa2a), region = 92 }
 0x919   : > { %1289 = vst.msk [vmem:[%s1929_s3] sm:$0xff] %vm732_vm1, %v1288_v7 }
 0x91c   : > { %v1286_v8 = vpop.f32.mrf.mxu1 }
 0x91d   : > { %v1296_v10 = vsel %vm732_vm1, %v1288_v7, 0.0  ;;  %v1692_v25 = vld [vmem:[%s2149_s18] ss:$0 sm:$0xff] }
 0x91e   : > { %1297 = vadd.xlane.f32.xlu0 %v1296_v10 }
 0x991   : > { %v1298_v11 = vpop.xlane.xlu0 %1297 }
 0x992   : > { %v1299_v12 = vmul.f32 %v1298_v11, %v1938_v9 }
 0x994   : > { %v1300_v13 = vsub.f32 %v1288_v7, %v1299_v12 }
 0x996   : > { %v1301_v14 = vmul.f32 %v1300_v13, %v1300_v13 }
 0x998   : > { %v1302_v15 = vsel %vm732_vm1, %v1301_v14, 0.0 }
 0x999   : > { %1303 = vadd.xlane.f32.xlu0 %v1302_v15 }
 0xa0c   : > { %v1304_v16 = vpop.xlane.xlu0 %1303 }
 0xa0d   : > { %v1305_v17 = vmul.f32 %v1304_v16, %v1938_v9  ;;  %v1693_v9 = vld [vmem:[%s2150_s0] ss:$0 sm:$0xff] }
 0xa0f   : > { %v1306_v18 = vadd.f32 1e-05, %v1305_v17 }
 0xa11   : > { %1694 = vrsqrt.f32 %v1306_v18  ;;  %vm1313_vm12 = vweird.f32 %v1306_v18 }
 0xa17   : > { %v1695_v19 = vpop.eup %1694 }
 0xa18   : > { %v1308_v20 = vmul.f32 %v1695_v19, %v1306_v18  ;;  %vm1314_vm11 = vweird.f32 %v1695_v19 }
 0xa19   : > { %vm1315_vm13 = vmor %vm1313_vm12, %vm1314_vm11 }
 0xa1a   : > { %v1309_v21 = vmul.f32 %v1695_v19, %v1308_v20 }
 0xa1c   : > { %v1310_v22 = vmul.f32 0.5, %v1309_v21 }
 0xa1e   : > { %v1311_v23 = vsub.f32 1.5, %v1310_v22 }
 0xa20   : > { %v1312_v24 = vmul.f32 %v1695_v19, %v1311_v23 }
 0xa22   : > { %v1316_v26 = vsel %vm1315_vm13, %v1695_v19, %v1312_v24 }
 0xa23   : > { %v1317_v27 = vmul.f32 %v1316_v26, %v1300_v13 }
 0xa25   : > { %v1321_v28 = vmul.f32 %v1692_v25, %v1317_v27 }
 0xa27   : > { %v1325_v29 = vadd.f32 %v1693_v9, %v1321_v28 }
 0xa29   : > { %1326 = vst.msk [vmem:[%s1929_s3] sm:$0xff] %vm732_vm1, %v1325_v29 }
 0xa2a PF: > { %s2151_s19 = sld [smem:[#allocation5_spill]] }
 0xa2b   : > { %s2152_s21 = sld [smem:[#allocation3_spill]] }
 0xa2c   : > { %s2153_s22 = sld [smem:[#allocation4_spill]] }
 0xa2d   : > { %s2154_s23 = sld [smem:[#allocation6_spill]] }
 0xa2e   : > { %s2155_s24 = sld [smem:[#allocation7_spill]] }
 0xa30   : > { %s26_s25 = sadd.s32 1, %s2151_s19  }
 0xa31   : > { %p23_p9 = scmp.ge.s32.totalorder %s26_s25, 6  }
 0xa33   :  { %25 = sbr.rel (!%p23_p9) target bundleno = 9 (0x9), region = 158 }

</bundles_post_ra>
